<compile_context>
chip_gen: v7x
topology: tpu7x:2x2x1
jax: 0.10.0
libtpu: 0.0.40
codegen_flags: <defaults>
</compile_context>

<pallas_src>
import functools

import jax
import jax.numpy as jnp
from jax.experimental import pallas as pl
from jax.experimental.pallas import tpu as pltpu


# ----------------------------- Pallas kernel -------------------------------

def ml_forward_kernel(v_ref, w_ref, c_ref, dv_ref, dw_ref, *, sign=1.0):
    V = v_ref[...].astype(jnp.float32)    # (tb, tl)
    w = w_ref[...].astype(jnp.float32)    # (tb, tl)
    c = c_ref[...]                        # (1, tl) = W*Iapp + gl*El (broadcasts)

    # Constants from ML.forward (divides by constants pre-reciprocated).
    half_phi = jnp.float32(1.0 / 30.0)    # phi / 2 = (2/30)/2
    V1 = jnp.float32(-1.2)
    V3 = jnp.float32(12.0)
    inv_V2 = jnp.float32(1.0 / 18.0)      # 1/V2
    inv_2V4 = jnp.float32(1.0 / 34.0)     # 1/(2*V4)
    gca = jnp.float32(4.0)
    Eca = jnp.float32(120.0)
    gk = jnp.float32(8.0)
    Ek = jnp.float32(-84.0)
    gl = jnp.float32(2.0)

    # NOTE: ML.forward also computes T = sigmoid((V - Vt)*Kp) but never uses it
    # in the returned derivatives (dead code) -> omitted.

    # minf: one native EUP tanh (argument identical to the reference).
    minf = 0.5 * (1.0 + jnp.tanh((V - V1) * inv_V2))

    # dVdt:  c - gl*V == z - gl*(V - El)  with c = W*Iapp + gl*El.
    dVdt = c - gca * minf * (V - Eca) - gk * w * (V - Ek) - gl * V

    # dwdt = phi*(winf - w)*cosh(y),  y = (V-V3)/(2*V4)
    #   winf    = 0.5*(1 + tanh(2y)) = u^4/(u^4+1)       (u = exp(y))
    #   cosh(y) = (u^2 + 1)/(2u)
    # => dwdt = (phi/2) * ((1-w)*u^4 - w) * (u^2+1) / (u*(u^4+1))
    u = jnp.exp((V - V3) * inv_2V4)
    u2 = u * u
    u4 = u2 * u2
    num = ((1.0 - w) * u4 - w) * (u2 + 1.0)
    den = u * (u4 + 1.0)
    dwdt = (half_phi * num) / den          # exact division (VALU slack is free)

    if sign != 1.0:                        # self.backwards support (trace-time)
        dVdt = -dVdt
        dwdt = -dwdt

    dv_ref[...] = dVdt.astype(dv_ref.dtype)
    dw_ref[...] = dwdt.astype(dw_ref.dtype)


# ------------------------------- Wrapper ------------------------------------

def _round_up(x, m):
    return ((x + m - 1) // m) * m


def _largest_divisor(n, cap):
    for k in range(min(n, cap), 0, -1):
        if n % k == 0:
            return k
    return 1


def ml_forward(V, w, W, El, Iapp, *, backwards=False):
    """Computes (dVdt, dwdt) for the Morris-Lecar system.

    V, w:        (B, L) state
    W, El, Iapp: (L,)   per-neuron parameters
    """
    B, L = V.shape
    gl = jnp.float32(2.0)

    Vf = V.astype(jnp.float32)
    wf = w.astype(jnp.float32)
    # Precombine per-neuron constants into a single (1, L) stream.
    c = (W.astype(jnp.float32) * Iapp.astype(jnp.float32)
         + gl * El.astype(jnp.float32)).reshape(1, L)

    # ---- L (lane) tiling: pad to a multiple of 128, tile <= 2048 that divides Lp.
    Lp = _round_up(L, 128)
    tl = 128 * _largest_divisor(Lp // 128, 2048 // 128)

    # ---- B (sublane) tiling: avoid padding by using a full-extent block when
    # B is not a multiple of 8 (legal: block dim == full array dim).
    if B % 8 == 0 or B > 256:
        Bp = _round_up(B, 8)
        tb = 8 * _largest_divisor(Bp // 8, 256 // 8)
    else:
        Bp, tb = B, B

    # ---- v7x megacore: make sure a tiny problem still yields >= 2 grid steps.
    if (Lp // tl) * (Bp // tb) == 1:
        if tl >= 256 and (tl // 2) % 128 == 0:
            tl //= 2
        elif tb % 16 == 0:
            tb //= 2

    if Lp != L or Bp != B:
        Vf = jnp.pad(Vf, ((0, Bp - B), (0, Lp - L)))
        wf = jnp.pad(wf, ((0, Bp - B), (0, Lp - L)))
        c = jnp.pad(c, ((0, 0), (0, Lp - L)))

    # Grid = (L-tiles, B-tiles): batch axis innermost -> the (1, tl) param block
    # index (0, jl) is constant across inner steps (no re-DMA of c).
    state_spec = pl.BlockSpec((tb, tl), lambda jl, ib: (ib, jl))
    param_spec = pl.BlockSpec((1, tl), lambda jl, ib: (0, jl))

    kernel = functools.partial(ml_forward_kernel, sign=-1.0 if backwards else 1.0)

    dV, dw = pl.pallas_call(
        kernel,
        out_shape=(
            jax.ShapeDtypeStruct((Bp, Lp), jnp.float32),
            jax.ShapeDtypeStruct((Bp, Lp), jnp.float32),
        ),
        grid=(Lp // tl, Bp // tb),
        in_specs=[state_spec, state_spec, param_spec],
        out_specs=(state_spec, state_spec),
        compiler_params=pltpu.CompilerParams(
            dimension_semantics=("parallel", "parallel"),
            vmem_limit_bytes=40 * 1024 * 1024),
    )(Vf, wf, c)

    if Lp != L or Bp != B:
        dV = dV[:B, :L]
        dw = dw[:B, :L]
    return dV, dw


# Pure-JAX reference (faithful to the original ML.forward formulas).
def ml_forward_ref(V, w, W, El, Iapp):
    phi, V1, V2, V3, V4 = 2.0 / 30.0, -1.2, 18.0, 12.0, 17.0
    gca, Eca, gk, Ek, gl = 4.0, 120.0, 8.0, -84.0, 2.0
    z = W * Iapp
    minf = 0.5 * (1 + jnp.tanh((V - V1) / V2))
    winf = 0.5 * (1 + jnp.tanh((V - V3) / V4))
    tauw = 1.0 / jnp.cosh((V - V3) / (2 * V4))
    dVdt = z - gca * minf * (V - Eca) - gk * w * (V - Ek) - gl * (V - El)
    dwdt = phi * (winf - w) / tauw
    return dVdt, dwdt


if __name__ == "__main__":
    key = jax.random.PRNGKey(0)
    k_el, k_v, k_w, k_iapp = jax.random.split(key, 4)

    def make_case(B, L):
        W_param = jnp.ones((L,), jnp.float32)                              # nn.Parameter(ones(L))
        El = -55.0 + 2.5 * jax.random.normal(k_el, (L,), jnp.float32)      # normal(-55, 2.5)
        V0 = -40.0 + 5.0 * jax.random.normal(k_v, (L,), jnp.float32)       # normal(-40, 5)
        w0 = 0.5 + 0.1 * jax.random.normal(k_w, (L,), jnp.float32)         # normal(0.5, 0.1)
        Iapp = 80.0 + 10.0 * jax.random.normal(k_iapp, (L,), jnp.float32)  # applied current
        V = jnp.tile(V0[None, :], (B, 1))                                  # repeat(bsize, 1)
        w = jnp.tile(w0[None, :], (B, 1))
        return V, w, W_param, El, Iapp

    ok = True
    for (B, L) in [(2, 128), (3, 200)]:   # lane-aligned and ragged cases
        V, w, W_param, El, Iapp = make_case(B, L)

        dV, dw = ml_forward(V, w, W_param, El, Iapp)
        jax.block_until_ready((dV, dw))

        dV_ref, dw_ref = ml_forward_ref(V, w, W_param[None, :], El[None, :],
                                        Iapp[None, :])

        # dV: exact math modulo constant-reciprocal & reassociation.
        ok &= bool(jnp.allclose(dV, dV_ref, rtol=1e-4, atol=1e-2))
        # dw: shared-exp exact formulation (no approx reciprocals).
        ok &= bool(jnp.allclose(dw, dw_ref, rtol=1e-3, atol=1e-3))

    assert ok, "Pallas ML kernel does not match reference"
    print("KERNEL_OK")
</pallas_src>

<mosaic_0001>
module attributes {stable_mosaic.version = 11 : i64} {
  func.func @ml_forward_kernel(%arg0: i32, %arg1: i32, %arg2: memref<2x128xf32, #tpu.memory_space<vmem>>, %arg3: memref<2x128xf32, #tpu.memory_space<vmem>>, %arg4: memref<1x128xf32, #tpu.memory_space<vmem>>, %arg5: memref<2x128xf32, #tpu.memory_space<vmem>>, %arg6: memref<2x128xf32, #tpu.memory_space<vmem>>) attributes {dimension_semantics = [#tpu.dimension_semantics<parallel>, #tpu.dimension_semantics<parallel>], iteration_bounds = array<i64: 1, 1>, scalar_prefetch = 0 : i64, scratch_operands = 0 : i64, tpu.core_type = #tpu.core_type<tc>, window_params = [{transform_indices = @transform_0, window_bounds = array<i64: 2, 128>}, {transform_indices = @transform_1, window_bounds = array<i64: 2, 128>}, {transform_indices = @transform_2, window_bounds = array<i64: 1, 128>}, {transform_indices = @transform_3, window_bounds = array<i64: 2, 128>}, {transform_indices = @transform_4, window_bounds = array<i64: 2, 128>}]} {
    %c0 = arith.constant 0 : index
    %c0_0 = arith.constant 0 : index
    %0 = vector.load %arg2[%c0, %c0_0] : memref<2x128xf32, #tpu.memory_space<vmem>>, vector<2x128xf32>
    %c0_1 = arith.constant 0 : index
    %c0_2 = arith.constant 0 : index
    %1 = vector.load %arg3[%c0_1, %c0_2] : memref<2x128xf32, #tpu.memory_space<vmem>>, vector<2x128xf32>
    %c0_3 = arith.constant 0 : index
    %c0_4 = arith.constant 0 : index
    %2 = vector.load %arg4[%c0_3, %c0_4] : memref<1x128xf32, #tpu.memory_space<vmem>>, vector<1x128xf32>
    %cst = arith.constant -1.200000e+00 : f32
    %3 = vector.broadcast %cst : f32 to vector<2x128xf32>
    %4 = arith.subf %0, %3 : vector<2x128xf32>
    %cst_5 = arith.constant 0.055555556 : f32
    %5 = vector.broadcast %cst_5 : f32 to vector<2x128xf32>
    %6 = arith.mulf %4, %5 : vector<2x128xf32>
    %7 = math.tanh %6 : vector<2x128xf32>
    %cst_6 = arith.constant 1.000000e+00 : f32
    %8 = vector.broadcast %cst_6 : f32 to vector<2x128xf32>
    %9 = arith.addf %8, %7 : vector<2x128xf32>
    %cst_7 = arith.constant 5.000000e-01 : f32
    %10 = vector.broadcast %cst_7 : f32 to vector<2x128xf32>
    %11 = arith.mulf %10, %9 : vector<2x128xf32>
    %cst_8 = arith.constant 4.000000e+00 : f32
    %12 = vector.broadcast %cst_8 : f32 to vector<2x128xf32>
    %13 = arith.mulf %12, %11 : vector<2x128xf32>
    %cst_9 = arith.constant 1.200000e+02 : f32
    %14 = vector.broadcast %cst_9 : f32 to vector<2x128xf32>
    %15 = arith.subf %0, %14 : vector<2x128xf32>
    %16 = arith.mulf %13, %15 : vector<2x128xf32>
    %17 = vector.broadcast %2 : vector<1x128xf32> to vector<2x128xf32>
    %18 = arith.subf %17, %16 : vector<2x128xf32>
    %cst_10 = arith.constant 8.000000e+00 : f32
    %19 = vector.broadcast %cst_10 : f32 to vector<2x128xf32>
    %20 = arith.mulf %19, %1 : vector<2x128xf32>
    %cst_11 = arith.constant -8.400000e+01 : f32
    %21 = vector.broadcast %cst_11 : f32 to vector<2x128xf32>
    %22 = arith.subf %0, %21 : vector<2x128xf32>
    %23 = arith.mulf %20, %22 : vector<2x128xf32>
    %24 = arith.subf %18, %23 : vector<2x128xf32>
    %cst_12 = arith.constant 2.000000e+00 : f32
    %25 = vector.broadcast %cst_12 : f32 to vector<2x128xf32>
    %26 = arith.mulf %25, %0 : vector<2x128xf32>
    %27 = arith.subf %24, %26 : vector<2x128xf32>
    %cst_13 = arith.constant 1.200000e+01 : f32
    %28 = vector.broadcast %cst_13 : f32 to vector<2x128xf32>
    %29 = arith.subf %0, %28 : vector<2x128xf32>
    %cst_14 = arith.constant 0.0294117648 : f32
    %30 = vector.broadcast %cst_14 : f32 to vector<2x128xf32>
    %31 = arith.mulf %29, %30 : vector<2x128xf32>
    %32 = math.exp %31 : vector<2x128xf32>
    %33 = arith.mulf %32, %32 : vector<2x128xf32>
    %34 = arith.mulf %33, %33 : vector<2x128xf32>
    %cst_15 = arith.constant 1.000000e+00 : f32
    %35 = vector.broadcast %cst_15 : f32 to vector<2x128xf32>
    %36 = arith.subf %35, %1 : vector<2x128xf32>
    %37 = arith.mulf %36, %34 : vector<2x128xf32>
    %38 = arith.subf %37, %1 : vector<2x128xf32>
    %cst_16 = arith.constant 1.000000e+00 : f32
    %39 = vector.broadcast %cst_16 : f32 to vector<2x128xf32>
    %40 = arith.addf %33, %39 : vector<2x128xf32>
    %41 = arith.mulf %38, %40 : vector<2x128xf32>
    %cst_17 = arith.constant 1.000000e+00 : f32
    %42 = vector.broadcast %cst_17 : f32 to vector<2x128xf32>
    %43 = arith.addf %34, %42 : vector<2x128xf32>
    %44 = arith.mulf %32, %43 : vector<2x128xf32>
    %cst_18 = arith.constant 0.0333333351 : f32
    %45 = vector.broadcast %cst_18 : f32 to vector<2x128xf32>
    %46 = arith.mulf %45, %41 : vector<2x128xf32>
    %47 = arith.divf %46, %44 : vector<2x128xf32>
    %c0_19 = arith.constant 0 : index
    %c0_20 = arith.constant 0 : index
    %48 = vector.load %arg5[%c0_19, %c0_20] : memref<2x128xf32, #tpu.memory_space<vmem>>, vector<2x128xf32>
    tpu.vector_store %arg5[%c0_19, %c0_20], %27 {strides = array<i32>} : memref<2x128xf32, #tpu.memory_space<vmem>>, vector<2x128xf32>,
    %c0_21 = arith.constant 0 : index
    %c0_22 = arith.constant 0 : index
    %49 = vector.load %arg6[%c0_21, %c0_22] : memref<2x128xf32, #tpu.memory_space<vmem>>, vector<2x128xf32>
    tpu.vector_store %arg6[%c0_21, %c0_22], %47 {strides = array<i32>} : memref<2x128xf32, #tpu.memory_space<vmem>>, vector<2x128xf32>,
    return
  }
  func.func @transform_0(%arg0: i32, %arg1: i32) -> (i32, i32) {
    %c0_i32 = arith.constant 0 : i32
    return %arg1, %arg0 : i32, i32
  }
  func.func @transform_1(%arg0: i32, %arg1: i32) -> (i32, i32) {
    %c0_i32 = arith.constant 0 : i32
    return %arg1, %arg0 : i32, i32
  }
  func.func @transform_2(%arg0: i32, %arg1: i32) -> (i32, i32) {
    %c0_i32 = arith.constant 0 : i32
    %c0_i32_0 = arith.constant 0 : i32
    return %c0_i32, %arg0 : i32, i32
  }
  func.func @transform_3(%arg0: i32, %arg1: i32) -> (i32, i32) {
    %c0_i32 = arith.constant 0 : i32
    return %arg1, %arg0 : i32, i32
  }
  func.func @transform_4(%arg0: i32, %arg1: i32) -> (i32, i32) {
    %c0_i32 = arith.constant 0 : i32
    return %arg1, %arg0 : i32, i32
  }
}

</mosaic_0001>

<bundles_post_ra>
// kernel: tpu_custom_call.1
= control target key start
LH: loop header
LB: loop body
LE: loop exit
PB: predicated region body
PF: predicated region fallthrough
CT: control target
= control target key end

     0   :  { %10 = vsyncpa [#allocation3], 0  ;;  %s257_s0 = inlined_call_operand.hbm [shape: f32[2,128], index: 0, kind: input, shape index: {}]   ;;  %s258_s1 = inlined_call_operand.vmem [shape: f32[2,128], index: 1, kind: input, shape index: {}]   ;;  %s259_s2 = inlined_call_operand.vmem [shape: f32[1,128], index: 2, kind: input, shape index: {}]   ;;  %s260_s3 = inlined_call_operand.hbm [shape: f32[2,128], index: 3, kind: output, shape index: {0}]   ;;  %s261_s4 = inlined_call_operand.hbm [shape: f32[2,128], index: 4, kind: output, shape index: {1}]  }
   0x1   :  { %11 = vsyncpa [#allocation4], 0 }
   0x2   :  { %12 = vsyncpa [#allocation7], 0  ;;  %s187_s15 = smov [#allocation2]   ;;  %s115_s19 = scalar_lea.hbm %s257_s0, 32 }
   0x3   :  { %s19_s16 = sshll.u32 %s187_s15, 4  ;;  %p116_p0 = scmp.ne.s32.totalorder %s257_s0, %s115_s19  ;;  %s20_s16 = int_to_ptr.vmem [resolvable:$true] %s19_s16 }
   0x4   :  { %p119_p1 = scmp.lt.u32.totalorder %s115_s19, %s257_s0 }
   0x6   :  { %p121_p2 = pnand %p119_p1, %p116_p0 }
   0x8   :  { %124 = shalt.err (!%p121_p2)
}
   0x9   :  { %s125_s24 = scalar_lea.vmem %s20_s16, 32  ;;  %p130_p4 = scmp.lt.s32.totalorder %s20_s16, %s20_s16 }
   0xa   :  { %p126_p3 = scmp.ne.s32.totalorder %s20_s16, %s125_s24  ;;  %p131_p5 = scmp.lt.s32.totalorder %s125_s24, %s125_s24 }
   0xc   :  { %p132_p6 = por %p131_p5, %p130_p4 }
   0xe   :  { %p133_p7 = pnand %p132_p6, %p126_p3 }
  0x10   :  { %136 = shalt.err (!%p133_p7)
}
  0x11   :  { %22 = dma.hbm_to_vmem [thread:$0]  %s257_s0, 32, %s20_s16, [#allocation3]  }
  0x12   :  { %181 = dma.done.wait [#allocation3], 32  }
  0x13   :  { %182 = vsyncadd [#allocation3], 4294967264  ;;  %v30_v0 = vld [vmem:[#allocation2] sm:$0x3] }
  0x14   :  { %v101_v1 = vadd.f32 1.2, %v30_v0  ;;  %v105_v2 = vadd.f32 -12.0, %v30_v0  ;;  %v31_v7 = vld [vmem:[%s258_s1] sm:$0x3]  ;;  %v102_v11 = vadd.f32 -120.0, %v30_v0 }
  0x15   :  { %v48_v12 = vmul.f32 8.0, %v31_v7  ;;  %v104_v13 = vadd.f32 84.0, %v30_v0  ;;  %v60_v15 = vsub.f32 1.0, %v31_v7  ;;  %v103_v17 = vld [vmem:[%s259_s2] ss:$0 sm:$0xff]  ;;  %v52_v24 = vmul.f32 2.0, %v30_v0 }
  0x16   :  { %v34_v3 = vmul.f32 0.055555556, %v101_v1  ;;  %v55_v4 = vmul.f32 0.029411765, %v105_v2  ;;  %s188_s1 = smov [#allocation5]  }
  0x17   :  { %v50_v20 = vmul.f32 %v104_v13, %v48_v12  ;;  %s78_s30 = sshll.u32 %s188_s1, 4  ;;  %s79_s30 = int_to_ptr.vmem [resolvable:$true] %s78_s30 }
  0x18   :  { %109 = vtanh.f32 %v34_v3  ;;  %v56_v5 = vmul.f32 1.442695, %v55_v4  ;;  %s137_s5 = scalar_lea.vmem %s79_s30, 32  ;;  %p142_p9 = scmp.lt.s32.totalorder %s79_s30, %s79_s30 }
  0x19   :  { %p138_p8 = scmp.ne.s32.totalorder %s79_s30, %s137_s5  ;;  %p143_p10 = scmp.lt.s32.totalorder %s137_s5, %s137_s5 }
  0x1a   :  { %111 = vpow2.f32 %v56_v5 }
  0x1b   :  { %p144_p11 = por %p143_p10, %p142_p9 }
  0x1d   :  { %p145_p12 = pnand %p144_p11, %p138_p8 }
  0x22   :  { %v110_v6 = vpop.eup %109 }
  0x23   :  { %v36_v8 = vadd.f32 1.0, %v110_v6 }
  0x24   :  { %v112_v9 = vpop.eup %111 }
  0x25   :  { %v37_v10 = vmul.f32 0.5, %v36_v8  ;;  %v58_v14 = vmul.f32 %v112_v9, %v112_v9 }
  0x27   :  { %v38_v16 = vmul.f32 4.0, %v37_v10  ;;  %v59_v18 = vmul.f32 %v58_v14, %v58_v14  ;;  %v63_v28 = vadd.f32 1.0, %v58_v14 }
  0x29   :  { %v40_v19 = vmul.f32 %v102_v11, %v38_v16  ;;  %v61_v21 = vmul.f32 %v60_v15, %v59_v18  ;;  %v65_v22 = vadd.f32 1.0, %v59_v18 }
  0x2b   :  { %v47_v23 = vsub.f32 %v103_v17, %v40_v19  ;;  %v66_v25 = vmul.f32 %v112_v9, %v65_v22  ;;  %v62_v27 = vsub.f32 %v61_v21, %v31_v7 }
  0x2d   :  { %v51_v26 = vsub.f32 %v47_v23, %v50_v20  ;;  %113 = vrcp.f32 %v66_v25  ;;  %v64_v30 = vmul.f32 %v63_v28, %v62_v27 }
  0x2f   :  { %v53_v29 = vsub.f32 %v51_v26, %v52_v24 }
  0x31   :  { %70 = vst [vmem:[#allocation5] sm:$0x3] %v53_v29 }
  0x32   :  { %148 = shalt.err (!%p145_p12)
}
  0x33   :  { %s149_s7 = scalar_lea.hbm %s260_s3, 32 }
  0x34   :  { %p150_p13 = scmp.ne.s32.totalorder %s260_s3, %s149_s7  ;;  %p153_p0 = scmp.lt.u32.totalorder %s149_s7, %s260_s3 }
  0x36   :  { %p155_p1 = pnand %p153_p0, %p150_p13 }
  0x38   :  { %158 = shalt.err (!%p155_p1)
}
  0x39   :  { %81 = dma.vmem_to_hbm [thread:$0]  %s79_s30, 32, %s260_s3, [#allocation4]   ;;  %v67_v31 = vmul.f32 0.033333335, %v64_v30  ;;  %v114_v32 = vpop.eup %113 }
  0x3a   :  { %s189_s14 = smov [#allocation6]  }
  0x3b   :  { %s88_s15 = sshll.u32 %s189_s14, 4  ;;  %v69_v33 = vmul.f32 %v114_v32, %v67_v31  ;;  %s89_s15 = int_to_ptr.vmem [resolvable:$true] %s88_s15 }
  0x3c   :  { %s159_s16 = scalar_lea.vmem %s89_s15, 32  ;;  %p164_p3 = scmp.lt.s32.totalorder %s89_s15, %s89_s15 }
  0x3d   :  { %71 = vst [vmem:[#allocation6] sm:$0x3] %v69_v33  ;;  %p160_p2 = scmp.ne.s32.totalorder %s89_s15, %s159_s16  ;;  %p165_p4 = scmp.lt.s32.totalorder %s159_s16, %s159_s16 }
  0x3f   :  { %p166_p5 = por %p165_p4, %p164_p3 }
  0x41   :  { %p167_p6 = pnand %p166_p5, %p160_p2 }
  0x43   :  { %170 = shalt.err (!%p167_p6)
}
  0x44   :  { %s171_s19 = scalar_lea.hbm %s261_s4, 32 }
  0x45   :  { %p172_p7 = scmp.ne.s32.totalorder %s261_s4, %s171_s19  ;;  %p175_p8 = scmp.lt.u32.totalorder %s171_s19, %s261_s4 }
  0x47   :  { %p177_p9 = pnand %p175_p8, %p172_p7 }
  0x49   :  { %180 = shalt.err (!%p177_p9)
}
  0x4a   :  { %91 = dma.vmem_to_hbm [thread:$0]  %s89_s15, 32, %s261_s4, [#allocation7]  }
  0x4b   :  { %183 = dma.done.wait [#allocation4], 32  }
  0x4c   :  { %184 = vsyncadd [#allocation4], 4294967264 }
  0x4d   :  { %185 = dma.done.wait [#allocation7], 32  }
  0x4e   :  { %186 = vsyncadd [#allocation7], 4294967264 }
  0x4f   :  { %98 = vsyncpa [#allocation3], 1 }
  0x50   :  { %99 = vsyncpa [#allocation4], 1 }
  0x51   :  { %100 = vsyncpa [#allocation7], 1 }

</bundles_post_ra>
